<compile_context>
chip_gen: v5e
topology: v5e:2x2
jax: 0.10.0
libtpu: 0.0.40
codegen_flags: <defaults>
</compile_context>

<pallas_src>
import jax
import jax.numpy as jnp
from jax.experimental import pallas as pl
from jax.experimental.pallas import tpu as pltpu


def _partial_down_kernel(x_ref, w_ref, out_ref):
    # One MXU matmul does everything: the block-diagonal weight already carries the
    # partial-conv renormalisation (folded into the patch rows), the bias (multiplied
    # by the appended "valid" column) and the hole masking (hole rows are all-zero).
    acc = jnp.dot(x_ref[...], w_ref[...], preferred_element_type=jnp.float32)
    out_ref[...] = jnp.maximum(acc, 0.0).astype(out_ref.dtype)   # ReLU epilogue (f32)


def _round_up(a, b):
    return ((a + b - 1) // b) * b


def _extract_patches(x, kernel_size, stride, padding):
    """x: [N, C, H, W] (NCHW) -> ([N*Ho*Wo, C*K*K], Ho, Wo).  Plain-JAX im2col glue."""
    N, C, H, W = x.shape
    K = kernel_size
    Ho = (H + 2 * padding - K) // stride + 1
    Wo = (W + 2 * padding - K) // stride + 1
    xp = jnp.pad(x, ((0, 0), (0, 0), (padding, padding), (padding, padding)))
    cols = []
    for kh in range(K):
        for kw in range(K):
            cols.append(
                jax.lax.slice(
                    xp,
                    (0, 0, kh, kw),
                    (N, C, kh + (Ho - 1) * stride + 1, kw + (Wo - 1) * stride + 1),
                    (1, 1, stride, stride)))                      # [N, C, Ho, Wo]
    p = jnp.stack(cols, axis=2)                                    # [N, C, K*K, Ho, Wo]
    p = p.reshape(N, C * K * K, Ho, Wo)
    p = jnp.transpose(p, (0, 2, 3, 1))                             # [N, Ho, Wo, C*K*K]
    return p.reshape(N * Ho * Wo, C * K * K), Ho, Wo


def partial_down(x, m, weight, bias, kernel_size=3, stride=2, padding=1,
                 tile_rows=2048, compute_dtype=jnp.bfloat16):
    """Forward of PartialDown.  x, m: [N, C_in, H, W] NCHW; returns NCHW (x_, m_)."""
    N, Cin, H, W = x.shape
    Cout = weight.shape[0]
    K = kernel_size
    Kd = Cin * K * K

    # ---------------- plain-JAX glue (fused by XLA) ----------------
    xp, Ho, Wo = _extract_patches((x * m).astype(jnp.float32), K, stride, padding)  # [M, Kd]
    M = N * Ho * Wo

    # mask "conv" with an all-ones kernel == windowed sum of the mask.  Computed with
    # reduce_window directly on m: no [M, Kd] mask-patch matrix is built or DMA'd.
    msum = jax.lax.reduce_window(
        m.astype(jnp.float32).sum(axis=1), 0.0, jax.lax.add,
        window_dimensions=(1, K, K), window_strides=(1, stride, stride),
        padding=((0, 0), (padding, padding), (padding, padding)))   # [N, Ho, Wo]
    msum = msum.reshape(M)
    valid = (msum > 0.0).astype(jnp.float32)                        # [M], {0,1}
    scale = valid / jnp.where(msum > 0.0, msum, 1.0)                # 1/mask_sum, 0 on holes

    # ---------------- lane-dense packing ----------------
    # PACK consecutive output pixels share one 128-lane row of the packed output.
    PACK = 128 // Cout if (Cout <= 128 and 128 % Cout == 0) else 1
    # Pad the patch axis so the packed contraction dim is lane aligned; the extra
    # column (index Kd) carries `valid`, which multiplies the bias row of the weights.
    Kd_pad = _round_up(Kd + 1, max(8, 128 // PACK))

    # Renormalise in f32, then drop to the compute dtype immediately so the pad /
    # packed-reshape intermediates and the kernel input DMA move half the bytes.
    xp_aug = jnp.concatenate(
        [xp * scale[:, None],                                       # renormalised patches (f32)
         valid[:, None],                                            # bias/hole-mask column
         jnp.zeros((M, Kd_pad - Kd - 1), jnp.float32)], axis=1)     # [M, Kd_pad]
    xp_aug = xp_aug.astype(compute_dtype)

    # Augmented weights [W ; bias ; 0], then PACK-way block-diagonal so the kernel's
    # single matmul emits a lane-dense (tm, PACK*Cout) tile directly.
    w_aug = jnp.concatenate(
        [weight.reshape(Cout, Kd).T.astype(jnp.float32),
         bias.reshape(1, Cout).astype(jnp.float32),
         jnp.zeros((Kd_pad - Kd - 1, Cout), jnp.float32)], axis=0)  # [Kd_pad, Cout]
    w_big = jnp.kron(jnp.eye(PACK, dtype=jnp.float32), w_aug)       # [PACK*Kd_pad, PACK*Cout]
    w_big = w_big.astype(compute_dtype)

    # Row padding so PACK and the row tile divide evenly (no divisibility assert).
    M4 = pl.cdiv(M, PACK)
    tm = min(tile_rows, _round_up(M4, 16))                          # multiple of 8 sublanes
    M4_pad = _round_up(M4, tm)
    M_pad = M4_pad * PACK
    xp_aug = jnp.pad(xp_aug, ((0, M_pad - M), (0, 0)))

    x_big = xp_aug.reshape(M4_pad, PACK * Kd_pad)                   # free row-major reshape

    out_big = pl.pallas_call(
        _partial_down_kernel,
        out_shape=jax.ShapeDtypeStruct((M4_pad, PACK * Cout), jnp.float32),
        grid_spec=pltpu.PrefetchScalarGridSpec(
            num_scalar_prefetch=0,
            grid=(M4_pad // tm,),
            in_specs=[pl.BlockSpec((tm, PACK * Kd_pad), lambda i: (i, 0)),           # packed patches
                      pl.BlockSpec((PACK * Kd_pad, PACK * Cout), lambda i: (0, 0))],  # weights (resident)
            out_specs=pl.BlockSpec((tm, PACK * Cout), lambda i: (i, 0))),
        compiler_params=pltpu.CompilerParams(
            dimension_semantics=("parallel",)),
    )(x_big, w_big)

    # ---------------- un-pack back to NCHW ----------------
    out = out_big.reshape(M_pad, Cout)[:M]                          # free row-major reshape
    out = out.reshape(N, Ho, Wo, Cout).transpose(0, 3, 1, 2)        # [N, Cout, Ho, Wo]

    # updated mask: derived in the wrapper from mask_sum > 0 (1 bit/row); the kernel
    # does not write the broadcast mask tensor.
    m_out = jnp.broadcast_to(valid.reshape(N, 1, Ho, Wo), (N, Cout, Ho, Wo))
    return out, m_out


if __name__ == "__main__":
    key = jax.random.PRNGKey(0)
    k1, k2, k3, k4 = jax.random.split(key, 4)

    # Module defaults: input_channel=3, output_channel=32, kernel=3, stride=2, pad=1
    N, Cin, H, W = 2, 3, 16, 16
    Cout, K, STRIDE, PAD = 32, 3, 2, 1

    x = jax.random.normal(k1, (N, Cin, H, W), jnp.float32)
    m = (jax.random.uniform(k2, (N, 1, H, W)) > 0.5).astype(jnp.float32)
    m = jnp.broadcast_to(m, (N, Cin, H, W))                         # binary hole mask

    # deterministic synthetic parameters (shapes from nn.Conv2d(3, 32, 3))
    weight = 0.1 * jax.random.normal(k3, (Cout, Cin, K, K), jnp.float32)
    bias = 0.1 * jax.random.normal(k4, (Cout,), jnp.float32)

    x_out, m_out = partial_down(x, m, weight, bias, K, STRIDE, PAD)
    jax.block_until_ready((x_out, m_out))
    assert x_out.shape == (N, Cout, H // 2, W // 2)
    assert m_out.shape == (N, Cout, H // 2, W // 2)

    # plain-JAX f32 reference (same partial-conv math) for a sanity check
    xp_ref, Ho, Wo = _extract_patches(x * m, K, STRIDE, PAD)
    mp_ref, _, _ = _extract_patches(m, K, STRIDE, PAD)
    msum_ref = mp_ref.sum(-1, keepdims=True)                        # [M, 1]
    holes = msum_ref == 0.0
    raw = xp_ref @ weight.reshape(Cout, -1).T                       # [M, Cout]
    ref = jnp.where(holes, 0.0, raw / jnp.where(holes, 1.0, msum_ref) + bias[None, :])
    ref = jnp.maximum(ref, 0.0).reshape(N, Ho, Wo, Cout).transpose(0, 3, 1, 2)
    ref_m = jnp.broadcast_to((msum_ref > 0.0).astype(jnp.float32).reshape(N, 1, Ho, Wo),
                             (N, Cout, Ho, Wo))
    assert jnp.allclose(x_out, ref, atol=5e-2, rtol=5e-2), float(jnp.max(jnp.abs(x_out - ref)))
    assert jnp.array_equal(m_out, ref_m)
    print("KERNEL_OK")
</pallas_src>

<mosaic_0001>
module attributes {stable_mosaic.version = 11 : i64} {
  func.func @_partial_down_kernel(%arg0: i32, %arg1: memref<32x128xbf16, #tpu.memory_space<vmem>>, %arg2: memref<128x128xbf16, #tpu.memory_space<vmem>>, %arg3: memref<32x128xf32, #tpu.memory_space<vmem>>) attributes {dimension_semantics = [#tpu.dimension_semantics<parallel>], iteration_bounds = array<i64: 1>, scalar_prefetch = 0 : i64, scratch_operands = 0 : i64, tpu.core_type = #tpu.core_type<tc>, window_params = [{transform_indices = @transform_0, window_bounds = array<i64: 32, 128>}, {pipeline_mode = #tpu.pipeline_mode<synchronous>, transform_indices = @transform_1, window_bounds = array<i64: 128, 128>}, {transform_indices = @transform_2, window_bounds = array<i64: 32, 128>}]} {
    %c0 = arith.constant 0 : index
    %c0_0 = arith.constant 0 : index
    %0 = vector.load %arg1[%c0, %c0_0] : memref<32x128xbf16, #tpu.memory_space<vmem>>, vector<32x128xbf16>
    %c0_1 = arith.constant 0 : index
    %c0_2 = arith.constant 0 : index
    %1 = vector.load %arg2[%c0_1, %c0_2] : memref<128x128xbf16, #tpu.memory_space<vmem>>, vector<128x128xbf16>
    %cst = arith.constant dense<0.000000e+00> : vector<32x128xf32>
    %2 = tpu.matmul %0, %1, %cst {dimension_numbers = #tpu.dot_dimension_numbers<[1], [0], [0], [1], [0, 0, 1, 1], [], []>} : vector<32x128xbf16>, vector<128x128xbf16>, vector<32x128xf32> -> vector<32x128xf32>
    %cst_3 = arith.constant 0.000000e+00 : f32
    %3 = vector.broadcast %cst_3 : f32 to vector<32x128xf32>
    %4 = arith.maximumf %2, %3 : vector<32x128xf32>
    %c0_4 = arith.constant 0 : index
    %c0_5 = arith.constant 0 : index
    %5 = vector.load %arg3[%c0_4, %c0_5] : memref<32x128xf32, #tpu.memory_space<vmem>>, vector<32x128xf32>
    tpu.vector_store %arg3[%c0_4, %c0_5], %4 {strides = array<i32>} : memref<32x128xf32, #tpu.memory_space<vmem>>, vector<32x128xf32>,
    return
  }
  func.func @transform_0(%arg0: i32) -> (i32, i32) {
    %c0_i32 = arith.constant 0 : i32
    %c0_i32_0 = arith.constant 0 : i32
    return %arg0, %c0_i32 : i32, i32
  }
  func.func @transform_1(%arg0: i32) -> (i32, i32) {
    %c0_i32 = arith.constant 0 : i32
    %c0_i32_0 = arith.constant 0 : i32
    %c0_i32_1 = arith.constant 0 : i32
    return %c0_i32, %c0_i32_0 : i32, i32
  }
  func.func @transform_2(%arg0: i32) -> (i32, i32) {
    %c0_i32 = arith.constant 0 : i32
    %c0_i32_0 = arith.constant 0 : i32
    return %arg0, %c0_i32 : i32, i32
  }
}

</mosaic_0001>

<bundles_post_ra>
// kernel: tpu_custom_call.1
= control target key start
LH: loop header
LB: loop body
LE: loop exit
PB: predicated region body
PF: predicated region fallthrough
CT: control target
= control target key end

     0   :  { %7 = vsyncpa [#allocation3], 0  ;;  %s345_s0 = inlined_call_operand.hbm [shape: bf16[32,128], index: 0, kind: input, shape index: {}]   ;;  %s346_s1 = inlined_call_operand.hbm [shape: bf16[128,128], index: 1, kind: input, shape index: {}]   ;;  %s347_s2 = inlined_call_operand.hbm [shape: f32[32,128], index: 2, kind: output, shape index: {}]  }
   0x1   :  { %8 = vsyncpa [#allocation6], 0 }
   0x2   :  { %9 = vsyncpa [#allocation4], 0  ;;  %s14_s11 = sshll.u32 %s345_s0, 4  ;;  %s314_s12 = smov [#allocation2]   ;;  %s15_s11 = int_to_ptr.hbm [resolvable:$true] %s14_s11 }
   0x3   :  { %s16_s13 = sshll.u32 %s314_s12, 4  ;;  %s27_s16 = sshll.u32 %s346_s1, 4  ;;  %s17_s13 = int_to_ptr.vmem [resolvable:$true] %s16_s13  ;;  %s28_s16 = int_to_ptr.hbm [resolvable:$true] %s27_s16 }
   0x4   :  { %s315_s17 = smov 64   ;;  %s316_s18 = smov 4  }
   0x5   :  { %22 = dma.hbm_to_vmem [thread:$0]  %s15_s11, 256, %s17_s13, [#allocation3], %s315_s17, %s315_s17, %s316_s18  }
   0x6   :  { %s317_s19 = smov [#allocation5]  }
   0x7   :  { %s29_s20 = sshll.u32 %s317_s19, 4  ;;  %s30_s20 = int_to_ptr.vmem [resolvable:$true] %s29_s20 }
   0x8   :  { %35 = dma.hbm_to_vmem [thread:$0]  %s28_s16, 1024, %s30_s20, [#allocation6], %s315_s17, %s315_s17, %s316_s18  }
   0x9   :  { %308 = dma.done.wait [#allocation3], 256  }
   0xa   :  { %309 = vsyncadd [#allocation3], 4294967040 }
   0xb   :  { %310 = dma.done.wait [#allocation6], 1024  }
   0xc   :  { %311 = vsyncadd [#allocation6], 4294966272  ;;  %v220_v0 = vld [vmem:[#allocation5 + $0x38] sm:$0xff]  ;;  %v219_v1 = vld [vmem:[#allocation5 + $0x30] sm:$0xff]  ;;  %s318_s0 = smov [#allocation7]   ;;  %s157_s23 = sshll.u32 %s347_s2, 4  ;;  %s158_s23 = int_to_ptr.hbm [resolvable:$true] %s157_s23 }
   0xd   :  { %124 = vmatpush.bf16.msra.mxu0 %v220_v0  ;;  %221 = vmatpush.bf16.msra.mxu1 %v220_v0  ;;  %v218_v2 = vld [vmem:[#allocation5 + $0x28] sm:$0xff]  ;;  %v217_v3 = vld [vmem:[#allocation5 + $0x20] sm:$0xff]  ;;  %v216_v4 = vld [vmem:[#allocation5 + $0x18] sm:$0xff]  ;;  %s155_s1 = sshll.u32 %s318_s0, 4  ;;  %s319_s24 = smov 128   ;;  %s156_s1 = int_to_ptr.vmem [resolvable:$true] %s155_s1 }
   0xe   :  { %v215_v5 = vld [vmem:[#allocation5 + $0x10] sm:$0xff]  ;;  %v214_v6 = vld [vmem:[#allocation5 + $0x8] sm:$0xff]  ;;  %v213_v7 = vld [vmem:[#allocation5] sm:$0xff]  ;;  %s320_s25 = smov 8  }
   0xf   :  { %v211_v8 = vld [vmem:[#allocation2] sm:$0xff]  ;;  %v212_v9 = vld [vmem:[#allocation2 + $0x8] sm:$0xff] }
  0x11   :  { %125 = vmatpush.bf16.msra.mxu0 %v219_v1  ;;  %222 = vmatpush.bf16.msra.mxu1 %v219_v1 }
  0x15   :  { %126 = vmatpush.bf16.msra.mxu0 %v218_v2  ;;  %223 = vmatpush.bf16.msra.mxu1 %v218_v2 }
  0x19   :  { %127 = vmatpush.bf16.msra.mxu0 %v217_v3  ;;  %224 = vmatpush.bf16.msra.mxu1 %v217_v3 }
  0x1d   :  { %128 = vmatpush.bf16.msra.mxu0 %v216_v4  ;;  %225 = vmatpush.bf16.msra.mxu1 %v216_v4 }
  0x21   :  { %129 = vmatpush.bf16.msra.mxu0 %v215_v5  ;;  %226 = vmatpush.bf16.msra.mxu1 %v215_v5 }
  0x25   :  { %130 = vmatpush.bf16.msra.mxu0 %v214_v6  ;;  %227 = vmatpush.bf16.msra.mxu1 %v214_v6 }
  0x29   :  { %131 = vmatpush.bf16.msra.mxu0 %v213_v7  ;;  %228 = vmatpush.bf16.msra.mxu1 %v213_v7 }
  0x2c   :  { %132 = vmatmul.bf16.vlgmr.msra.gmra.mxu0 %v211_v8  ;;  %137 = vmatmul.bf16.vlgmr.msra.gmra.mxu1 %v212_v9 }
  0xa9   :  { %v133_v10 = vpop.f32.mrf.mxu0  ;;  %v138_v11 = vpop.f32.mrf.mxu1 }
  0xaa   :  { %v143_v12 = vmax.f32 %v133_v10, 0.0  ;;  %v145_v13 = vmax.f32 %v138_v11, 0.0 }
  0xac   :  { %147 = vst [vmem:[#allocation7] sm:$0xff] %v143_v12 }
  0xad   :  { %149 = vst [vmem:[#allocation7 + $0x10] sm:$0xff] %v145_v13 }
  0xb1   :  { %v135_v14 = vpop.f32.mrf.mxu0  ;;  %v140_v15 = vpop.f32.mrf.mxu1 }
  0xb2   :  { %v144_v16 = vmax.f32 %v135_v14, 0.0  ;;  %v146_v17 = vmax.f32 %v140_v15, 0.0 }
  0xb4   :  { %148 = vst [vmem:[#allocation7 + $0x8] sm:$0xff] %v144_v16 }
  0xb5   :  { %150 = vst [vmem:[#allocation7 + $0x18] sm:$0xff] %v146_v17 }
  0xb6   :  { %163 = dma.vmem_to_hbm [thread:$0]  %s156_s1, 512, %s158_s23, [#allocation4], %s319_s24, %s319_s24, %s320_s25  }
  0xb7   :  { %312 = dma.done.wait [#allocation4], 512  }
  0xb8   :  { %313 = vsyncadd [#allocation4], 4294966784 }
  0xb9   :  { %168 = vsyncpa [#allocation3], 1 }
  0xba   :  { %169 = vsyncpa [#allocation6], 1 }
  0xbb   :  { %170 = vsyncpa [#allocation4], 1 }

</bundles_post_ra>
